<compile_context>
chip_gen: v6e
topology: v6e:2x2x1
jax: 0.10.0
libtpu: 0.0.40
codegen_flags: <defaults>
</compile_context>

<pallas_src>
import math

import jax
import jax.numpy as jnp
from jax.experimental import pallas as pl
from jax.experimental.pallas import tpu as pltpu


_VMEM_LIMIT_BYTES = 48 * 1024 * 1024   # safe on v5e/v6e (128 MiB) and v7x (64 MiB/TC)
_VMEM_BUDGET_BYTES = 40 * 1024 * 1024  # auto-tiling target, leaves headroom under the limit


# ----------------------------------------------------------------------------
# Kernels: fused Linear + ReLU with K-reduction
# ----------------------------------------------------------------------------
def _linear_relu_kernel_f32(x_ref, w_ref, b_ref, o_ref):
    # NOTE: relies on (a) the output BlockSpec index ignoring k, and (b) k
    # being the innermost (fastest-varying) grid axis, so o_ref stays resident
    # across the whole K reduction. Do not reorder the grid.
    k = pl.program_id(2)

    @pl.when(k == 0)
    def _():
        o_ref[...] = jnp.zeros_like(o_ref)

    o_ref[...] += jnp.dot(
        x_ref[...], w_ref[...], preferred_element_type=jnp.float32
    )

    @pl.when(k == pl.num_programs(2) - 1)
    def _():
        o_ref[...] = jnp.maximum(o_ref[...] + b_ref[...], 0.0)


def _linear_relu_kernel_acc(x_ref, w_ref, b_ref, o_ref, acc_ref):
    # Scratch-accumulator variant for sub-f32 output dtypes.
    k = pl.program_id(2)

    @pl.when(k == 0)
    def _():
        acc_ref[...] = jnp.zeros_like(acc_ref)

    acc_ref[...] += jnp.dot(
        x_ref[...], w_ref[...], preferred_element_type=jnp.float32
    )

    @pl.when(k == pl.num_programs(2) - 1)
    def _():
        y = acc_ref[...] + b_ref[...]
        o_ref[...] = jnp.maximum(y, 0.0).astype(o_ref.dtype)


# ----------------------------------------------------------------------------
# Tiling helpers
# ----------------------------------------------------------------------------
def _round_up(x, m):
    return (x + m - 1) // m * m


def _pick_tile(dim, preferred):
    """Largest preferred tile that evenly divides `dim`, else the full dim."""
    for t in preferred:
        if t <= dim and dim % t == 0:
            return t
    return dim


def _vmem_bytes(tm, tn, tk, itemsize, use_acc):
    """Rough double-buffered VMEM footprint of one grid step."""
    buffered = 2 * (tm * tk + tk * tn + tn + tm * tn) * itemsize
    if use_acc:
        buffered += tm * tn * 4
    return buffered


# ----------------------------------------------------------------------------
# Wrapper
# ----------------------------------------------------------------------------
def linear_relu(x, w, b, *, tile_m=None, tile_n=None, tile_k=None):
    """y = relu(x @ w + b); w is (in_features, out_features)."""
    M0, K0 = x.shape
    K0w, N0 = w.shape
    assert K0 == K0w and b.shape == (N0,)
    out_dtype = x.dtype
    itemsize = jnp.dtype(out_dtype).itemsize

    # Pad to (8, 128)-friendly shapes so every store is a lane-dense unmasked
    # vst. Zero-padded K columns/rows contribute nothing to the dot; padded
    # output rows/cols are sliced off below.
    M = _round_up(M0, 8)
    K = _round_up(K0, 128)
    N = _round_up(N0, 128)
    if (M, K) != (M0, K0):
        x = jnp.pad(x, ((0, M - M0), (0, K - K0)))
    if (K, N) != (K0, N0):
        w = jnp.pad(w, ((0, K - K0), (0, N - N0)))
    if N != N0:
        b = jnp.pad(b, (0, N - N0))

    use_acc = out_dtype != jnp.float32

    # --- tile_m: largest multiple-of-8 tile dividing M (full M for tiny batches)
    tm = tile_m if tile_m is not None else _pick_tile(
        M, (512, 256, 128, 64, 32, 16, 8)
    )

    # --- tile_n: split N in two when possible so the "parallel" j axis has
    # extent >= 2 (keeps both v7x TensorCores busy); single-TC parts only pay a
    # tiny (tm, tk) activation re-fetch.  Always a multiple of 128.
    if tile_n is not None:
        tn = tile_n
    elif N % 256 == 0:
        tn = N // 2
    else:
        tn = N

    # --- tile_k: largest K divisor whose double-buffered slabs fit the budget.
    if tile_k is not None:
        tk = tile_k
    else:
        candidates = [c for c in (4096, 2048, 1024, 512, 256, 128)
                      if c <= K and K % c == 0]
        if not candidates:
            candidates = [K]
        tk = candidates[-1]
        for cand in candidates:
            if _vmem_bytes(tm, tn, cand, itemsize, use_acc) <= _VMEM_BUDGET_BYTES:
                tk = cand
                break

    assert M % tm == 0 and N % tn == 0 and K % tk == 0, (M, N, K, tm, tn, tk)
    est = _vmem_bytes(tm, tn, tk, itemsize, use_acc)
    assert est <= _VMEM_LIMIT_BYTES, (
        f"tile config (tm={tm}, tn={tn}, tk={tk}) needs ~{est} B of VMEM, "
        f"over the {_VMEM_LIMIT_BYTES} B limit (v7x has only 64 MiB per core)"
    )

    grid = (M // tm, N // tn, K // tk)

    in_specs = [
        pl.BlockSpec((tm, tk), lambda i, j, k: (i, k)),
        pl.BlockSpec((tk, tn), lambda i, j, k: (k, j)),
        pl.BlockSpec((1, tn), lambda i, j, k: (0, j)),
    ]
    out_specs = pl.BlockSpec((tm, tn), lambda i, j, k: (i, j))

    cost = pl.CostEstimate(
        flops=2 * M * K * N,
        transcendentals=0,
        bytes_accessed=(M * K + K * N + N + M * N) * itemsize,
    )

    kernel = _linear_relu_kernel_acc if use_acc else _linear_relu_kernel_f32
    scratch_shapes = [pltpu.VMEM((tm, tn), jnp.float32)] if use_acc else []

    out = pl.pallas_call(
        kernel,
        out_shape=jax.ShapeDtypeStruct((M, N), out_dtype),
        grid=grid,
        in_specs=in_specs,
        out_specs=out_specs,
        scratch_shapes=scratch_shapes,
        compiler_params=pltpu.CompilerParams(
            dimension_semantics=("parallel", "parallel", "arbitrary"),
            vmem_limit_bytes=_VMEM_LIMIT_BYTES,
        ),
        cost_estimate=cost,
    )(x, w, b.reshape(1, N))

    if (M, N) != (M0, N0):
        out = out[:M0, :N0]
    return out


# ----------------------------------------------------------------------------
# ImgNN forward: out = relu(denseL1(x))
# ----------------------------------------------------------------------------
def img_nn_forward(x, w, b):
    return linear_relu(x, w, b)


# ----------------------------------------------------------------------------
# Demo
# ----------------------------------------------------------------------------
if __name__ == "__main__":
    BATCH = 8
    INPUT_DIM = 1024   # small stand-in for the 4096 default
    OUTPUT_DIM = 256   # small stand-in for the 1024 default

    key = jax.random.PRNGKey(0)
    kx, kw, kb = jax.random.split(key, 3)

    bound = 1.0 / math.sqrt(INPUT_DIM)
    x = jax.random.normal(kx, (BATCH, INPUT_DIM), jnp.float32)
    # nn.Linear weight is (out, in); store it pre-transposed as (in, out).
    w = jax.random.uniform(kw, (INPUT_DIM, OUTPUT_DIM), jnp.float32, -bound, bound)
    b = jax.random.uniform(kb, (OUTPUT_DIM,), jnp.float32, -bound, bound)

    out = img_nn_forward(x, w, b)
    out = jax.block_until_ready(out)

    ref = jnp.maximum(x @ w + b, 0.0)
    assert out.shape == (BATCH, OUTPUT_DIM)
    assert jnp.allclose(out, ref, atol=1e-5, rtol=1e-5)
    print("KERNEL_OK")
</pallas_src>

<mosaic_0001>
module attributes {stable_mosaic.version = 11 : i64} {
  func.func @_linear_relu_kernel_f32(%arg0: i32, %arg1: i32, %arg2: i32, %arg3: memref<8x1024xf32, #tpu.memory_space<vmem>>, %arg4: memref<1024x128xf32, #tpu.memory_space<vmem>>, %arg5: memref<1x128xf32, #tpu.memory_space<vmem>>, %arg6: memref<8x128xf32, #tpu.memory_space<vmem>>) attributes {dimension_semantics = [#tpu.dimension_semantics<parallel>, #tpu.dimension_semantics<parallel>, #tpu.dimension_semantics<arbitrary>], iteration_bounds = array<i64: 1, 2, 1>, scalar_prefetch = 0 : i64, scratch_operands = 0 : i64, tpu.core_type = #tpu.core_type<tc>, window_params = [{transform_indices = @transform_0, window_bounds = array<i64: 8, 1024>}, {transform_indices = @transform_1, window_bounds = array<i64: 1024, 128>}, {transform_indices = @transform_2, window_bounds = array<i64: 1, 128>}, {transform_indices = @transform_3, window_bounds = array<i64: 8, 128>}]} {
    %c0_i32 = arith.constant 0 : i32
    %0 = arith.cmpi eq, %arg2, %c0_i32 : i32
    %1 = arith.extui %0 : i1 to i32
    %c0_i32_0 = arith.constant 0 : i32
    %2 = arith.cmpi ne, %1, %c0_i32_0 : i32
    scf.if %2 {
      %cst_10 = arith.constant 0.000000e+00 : f32
      %12 = vector.broadcast %cst_10 : f32 to vector<8x128xf32>
      %c0_11 = arith.constant 0 : index
      %c0_12 = arith.constant 0 : index
      %13 = vector.load %arg6[%c0_11, %c0_12] : memref<8x128xf32, #tpu.memory_space<vmem>>, vector<8x128xf32>
      tpu.vector_store %arg6[%c0_11, %c0_12], %12 {strides = array<i32>} : memref<8x128xf32, #tpu.memory_space<vmem>>, vector<8x128xf32>,
    } else {
    }
    %c0 = arith.constant 0 : index
    %c0_1 = arith.constant 0 : index
    %3 = vector.load %arg6[%c0, %c0_1] : memref<8x128xf32, #tpu.memory_space<vmem>>, vector<8x128xf32>
    %c0_2 = arith.constant 0 : index
    %c0_3 = arith.constant 0 : index
    %4 = vector.load %arg3[%c0_2, %c0_3] : memref<8x1024xf32, #tpu.memory_space<vmem>>, vector<8x1024xf32>
    %c0_4 = arith.constant 0 : index
    %c0_5 = arith.constant 0 : index
    %5 = vector.load %arg4[%c0_4, %c0_5] : memref<1024x128xf32, #tpu.memory_space<vmem>>, vector<1024x128xf32>
    %cst = arith.constant dense<0.000000e+00> : vector<8x128xf32>
    %6 = tpu.matmul %4, %5, %cst {dimension_numbers = #tpu.dot_dimension_numbers<[1], [0], [0], [1], [0, 0, 1, 1], [], []>} : vector<8x1024xf32>, vector<1024x128xf32>, vector<8x128xf32> -> vector<8x128xf32>
    %7 = arith.addf %3, %6 : vector<8x128xf32>
    %c0_6 = arith.constant 0 : index
    %c0_7 = arith.constant 0 : index
    %8 = vector.load %arg6[%c0_6, %c0_7] : memref<8x128xf32, #tpu.memory_space<vmem>>, vector<8x128xf32>
    tpu.vector_store %arg6[%c0_6, %c0_7], %7 {strides = array<i32>} : memref<8x128xf32, #tpu.memory_space<vmem>>, vector<8x128xf32>,
    %c0_i32_8 = arith.constant 0 : i32
    %9 = arith.cmpi eq, %arg2, %c0_i32_8 : i32
    %10 = arith.extui %9 : i1 to i32
    %c0_i32_9 = arith.constant 0 : i32
    %11 = arith.cmpi ne, %10, %c0_i32_9 : i32
    scf.if %11 {
      %c0_10 = arith.constant 0 : index
      %c0_11 = arith.constant 0 : index
      %12 = vector.load %arg6[%c0_10, %c0_11] : memref<8x128xf32, #tpu.memory_space<vmem>>, vector<8x128xf32>
      %c0_12 = arith.constant 0 : index
      %c0_13 = arith.constant 0 : index
      %13 = vector.load %arg5[%c0_12, %c0_13] : memref<1x128xf32, #tpu.memory_space<vmem>>, vector<1x128xf32>
      %14 = vector.broadcast %13 : vector<1x128xf32> to vector<8x128xf32>
      %15 = arith.addf %12, %14 : vector<8x128xf32>
      %cst_14 = arith.constant 0.000000e+00 : f32
      %16 = vector.broadcast %cst_14 : f32 to vector<8x128xf32>
      %17 = arith.maximumf %15, %16 : vector<8x128xf32>
      %c0_15 = arith.constant 0 : index
      %c0_16 = arith.constant 0 : index
      %18 = vector.load %arg6[%c0_15, %c0_16] : memref<8x128xf32, #tpu.memory_space<vmem>>, vector<8x128xf32>
      tpu.vector_store %arg6[%c0_15, %c0_16], %17 {strides = array<i32>} : memref<8x128xf32, #tpu.memory_space<vmem>>, vector<8x128xf32>,
    } else {
    }
    return
  }
  func.func @transform_0(%arg0: i32, %arg1: i32, %arg2: i32) -> (i32, i32) {
    %c0_i32 = arith.constant 0 : i32
    return %arg0, %arg2 : i32, i32
  }
  func.func @transform_1(%arg0: i32, %arg1: i32, %arg2: i32) -> (i32, i32) {
    %c0_i32 = arith.constant 0 : i32
    return %arg2, %arg1 : i32, i32
  }
  func.func @transform_2(%arg0: i32, %arg1: i32, %arg2: i32) -> (i32, i32) {
    %c0_i32 = arith.constant 0 : i32
    %c0_i32_0 = arith.constant 0 : i32
    return %c0_i32, %arg1 : i32, i32
  }
  func.func @transform_3(%arg0: i32, %arg1: i32, %arg2: i32) -> (i32, i32) {
    %c0_i32 = arith.constant 0 : i32
    return %arg0, %arg1 : i32, i32
  }
}

</mosaic_0001>

<bundles_post_ra>
// kernel: tpu_custom_call.1
= control target key start
LH: loop header
LB: loop body
LE: loop exit
PB: predicated region body
PF: predicated region fallthrough
CT: control target
= control target key end

     0   :  { %s1518_s0 = inlined_call_operand.hbm [shape: f32[8,1024], index: 0, kind: input, shape index: {}]   ;;  %s1519_s1 = inlined_call_operand.hbm [shape: f32[1024,256], index: 1, kind: input, shape index: {}]   ;;  %s1520_s2 = inlined_call_operand.vmem [shape: f32[1,256], index: 2, kind: input, shape index: {}]   ;;  %s1521_s3 = inlined_call_operand.hbm [shape: f32[8,256], index: 3, kind: output, shape index: {}]  }
   0x1   :  { %1524 = sst [smem:[#allocation11_spill]] %s1518_s0 }
   0x2   :  { %8 = vsyncpa [#allocation3], 0 }
   0x3   :  { %9 = vsyncpa [#allocation6], 0 }
   0x4   :  { %11 = vsyncpa [#allocation6 + $0x1], 0 }
   0x5   :  { %12 = vsyncpa [#allocation4], 0 }
   0x6   :  { %14 = vsyncpa [#allocation4 + $0x1], 0  ;;  %s1219_s12 = smov 0   ;;  %s1221_s13 = smov 0  }
   0x7   :  { %s1223_s14 = smov 0   ;;  %s1225_s15 = smov 0  }
   0x8   :  { %s1227_s16 = smov 0   ;;  %s1229_s17 = smov 0  }
   0x9 LB: > { %s820_s18 = sadd.s32 4294967295, %s1191_s17   ;;  %s821_s19 = sadd.s32 4294967294, %s1191_s17   ;;  %s1191_s17 = sphi %s1229_s17, %s20_s17   ;;  %s1187_s16 = sphi %s1227_s16, %s1542_s16   ;;  %s1183_s15 = sphi %s1225_s15, %s1541_s15   ;;  %s1179_s14 = sphi %s1223_s14, %s1540_s14   ;;  %s1175_s13 = sphi %s1221_s13, %s1539_s13   ;;  %s1171_s12 = sphi %s1219_s12, %s1538_s12  }
   0xa   : > { %s76_s20 = sadd.s32 1, %s1179_s14  ;;  %p83_p0 = scmp.ne.s32.totalorder %s1179_s14, %s1175_s13 }
   0xb   : > { %p84_p1 = scmp.eq.s32.totalorder %s1191_s17, 0  ;;  %p89_p2 = scmp.ne.s32.totalorder %s1175_s13, %s1171_s12 }
   0xc   : > { %p1257_p3 = scmp.eq.s32.totalorder %s820_s18, 0  ;;  %p141_p4 = scmp.eq.s32.totalorder %s820_s18, 1 }
   0xd   : > { %p1261_p5 = por %p84_p1, %p83_p0  ;;  %p147_p6 = scmp.eq.s32.totalorder %s821_s19, 1 }
   0xe   : > { %p1267_p7 = por %p1257_p3, %p89_p2  ;;  %p1271_p8 = por %p141_p4, %p83_p0 }
   0xf   : > { %p1275_p9 = por %p147_p6, %p89_p2  ;;  %p822_p10 = scmp.ge.s32.totalorder %s1191_s17, 1 }
  0x10   : > { %s1527_s23 = scalar_select %p1267_p7, 1, 0 }
  0x11   : > { %s1528_s24 = scalar_select %p1271_p8, 1, 0 }
  0x12   : > { %s1529_s25 = scalar_select %p1275_p9, 1, 0 }
  0x13   : > { %p154_p11 = scmp.lt.s32.totalorder %s1191_s17, 3  ;;  %s1193_s27 = smov [#allocation2]  }
  0x14   : > { %s172_s28 = sshll.u32 %s1193_s27, 4  ;;  %p997_p1 = scmp.lt.s32.totalorder %s1191_s17, 2  ;;  %s173_s28 = int_to_ptr.vmem [resolvable:$true] %s172_s28 }
  0x15   : > { %p1282_p13 = pnand %p822_p10, %p154_p11  ;;  %s35_s4 = sadd.s32 1, %s1187_s16 }
  0x16   : > { %p1291_p4 = pnand %p997_p1, %p1261_p5  ;;  %p37_p6 = scmp.ge.s32.totalorder %s35_s4, 2 }
  0x17   : > { %p984_p0 = pneg %p1282_p13  ;;  %s183_s5 = sand.u32 1, %s1179_s14  }
  0x18   : > { %s1064_s6 = scalar_lea.vmem %s173_s28, 1024  ;;  %p1072_p8 = scmp.lt.s32.totalorder %s173_s28, %s173_s28 }
  0x19   : > { %p1297_p2 = pnand %p984_p0, %p1257_p3  ;;  %p1065_p11 = scmp.ne.s32.totalorder %s173_s28, %s1064_s6 }
  0x1a   : > { %p1073_p5 = scmp.lt.s32.totalorder %s1064_s6, %s1064_s6 }
  0x1b   : > { %p1055_p10 = pneg %p1297_p2 }
  0x1c   : > { %p1074_p1 = por %p1073_p5, %p1072_p8 }
  0x1d   : > { %p1067_p12 = pnand %p1065_p11, %p1055_p10 }
  0x1f   : > { %p1068_p9 = pneg %p1067_p12 }
  0x21   : > { %p1075_p7 = pnand %p1074_p1, %p1068_p9 }
  0x23   : > { %1078 = shalt.err (!%p1075_p7)
}
  0x24   : > { %s1533_s0 = sld [smem:[#allocation11_spill]]  ;;  %s1544_s4 = smov (%p37_p6, %s35_s4), 0 }
  0x25   : > { %s825_s9 = sshll.u32 %s183_s5, 10  ;;  %s72_s10 = ssub.s32 %s1187_s16, %s1544_s4 }
  0x26   : > { %p74_p12 = scmp.eq.s32.totalorder %s72_s10, 0  ;;  %s826_s11 = sshll.u32 %s1187_s16, 7 }
  0x27   : > { %s195_s22 = scalar_lea.hbm %s1519_s1, %s826_s11  ;;  %s187_s27 = scalar_lea.vmem [#allocation5], %s825_s9 }
  0x28   : > { %s196_s30 = sshll.u32 %s187_s27, 4  ;;  %s184_s7 = scalar_lea.sflag [#allocation6], %s183_s5  ;;  %s197_s30 = int_to_ptr.vmem [resolvable:$true] %s196_s30 }
  0x29   : > { %s1321_s6 = scalar_select %p74_p12, %s1179_s14, %s76_s20  }
  0x2a   : > { %987 = dma.hbm_to_vmem [thread:$0]  (!%p1297_p2), %s1533_s0, 1024, %s173_s28, [#allocation3]  }
  0x2b   : > { %p1081_p7 = pneg %p1291_p4  ;;  %s1092_s28 = scalar_lea.vmem %s197_s30, 16384 }
  0x2c   : > { %p1093_p8 = scmp.ne.s32.totalorder %s197_s30, %s1092_s28  ;;  %s1194_s8 = smov [#allocation5]  }
  0x2d   : > { %s1097_s10 = sshll.u32 %s1194_s8, 4  ;;  %s1098_s10 = int_to_ptr.vmem [resolvable:$false] %s1097_s10 }
  0x2e   : > { %p1095_p9 = pnand %p1093_p8, %p1081_p7  ;;  %s1099_s0 = scalar_lea.vmem %s1098_s10, 32768 }
  0x2f   : > { %p1100_p2 = scmp.lt.s32.totalorder %s197_s30, %s1098_s10  ;;  %p1101_p6 = scmp.lt.s32.totalorder %s1099_s0, %s1092_s28 }
  0x30   : > { %p1096_p0 = pneg %p1095_p9 }
  0x31   : > { %p1102_p10 = por %p1101_p6, %p1100_p2 }
  0x33   : > { %p1103_p11 = pnand %p1102_p10, %p1096_p0 }
  0x35   : > { %1106 = shalt.err (!%p1103_p11)
}
  0x36   : > { %s1195_s9 = smov 256   ;;  %s1196_s20 = smov 128  }
  0x37   : > { %s1197_s11 = smov 8   ;;  %214 = sbr.rel (%p1282_p13) target bundleno = 352 (0x160), region = 32 }
  0x38   : > { %991 = dma.hbm_to_vmem [thread:$0]  (!%p1291_p4), %s195_s22, 16384, %s197_s30, %s184_s7, %s1195_s9, %s1196_s20, %s1197_s11  }
  0x3c   : > { %1158 = dma.done.wait (%p1257_p3), [#allocation3], 1024  }
  0x3d   : > { %1160 = vsyncadd (%p1257_p3), [#allocation3], 4294966272  ;;  %s1334_s0 = sand.u32 1, %s1175_s13   ;;  %p1534_p4 = scmp.ne.s32.totalorder %s1527_s23, 0 }
  0x3e   : > { %s829_s5 = sshll.u32 %s1334_s0, 10  ;;  %s221_s18 = scalar_lea.sflag [#allocation6], %s1334_s0 }
  0x3f   : > { %s1338_s19 = scalar_lea.vmem [#allocation5], %s829_s5 }
  0x40   : > { %1162 = dma.done.wait (%p1534_p4), %s221_s18, 16384  }
  0x41   : > { %1164 = vsyncadd (%p1534_p4), %s221_s18, 4294950912  ;;  %v300_v0 = vld [vmem:[%s1338_s19 + $0xf8] sm:$0xff]  ;;  %v299_v4 = vld [vmem:[%s1338_s19 + $0xf0] sm:$0xff]  ;;  %p252_p3 = scmp.lt.s32.totalorder %s1183_s15, 1  ;;  %s830_s23 = sshll.u32 %s1334_s0, 3 }
  0x42   : > { %v332_v1 = vld [vmem:[%s1338_s19 + $0x1f8] sm:$0xff]  ;;  %836 = vmatprep.subr.mxu0 %v300_v0  ;;  %v331_v5 = vld [vmem:[%s1338_s19 + $0x1f0] sm:$0xff]  ;;  %v298_v8 = vld [vmem:[%s1338_s19 + $0xe8] sm:$0xff]  ;;  %s833_s27 = sshll.u32 %s1183_s15, 7  ;;  %s249_s30 = scalar_lea.vmem [#allocation7], %s830_s23 }
  0x43   : > { %v284_v2 = vld [vmem:[%s1338_s19 + $0x78] sm:$0xff]  ;;  %871 = vmatprep.subr.mxu1 %v332_v1  ;;  %v283_v6 = vld [vmem:[%s1338_s19 + $0x70] sm:$0xff]  ;;  %v330_v9 = vld [vmem:[%s1338_s19 + $0x1e8] sm:$0xff]  ;;  %s253_s21 = scalar_select %p252_p3, %s1183_s15, 1 }
  0x44   : > { %v316_v3 = vld [vmem:[%s1338_s19 + $0x178] sm:$0xff]  ;;  %837 = vmatpush3.msra.mxu0 %v284_v2  ;;  %v315_v7 = vld [vmem:[%s1338_s19 + $0x170] sm:$0xff]  ;;  %v282_v10 = vld [vmem:[%s1338_s19 + $0x68] sm:$0xff]  ;;  %s709_s7 = sshll.u32 %s249_s30, 4  ;;  %s707_s10 = scalar_lea.hbm %s1521_s3, %s833_s27  ;;  %s710_s7 = int_to_ptr.vmem [resolvable:$true] %s709_s7 }
  0x45   : > { %872 = vmatpush3.msra.mxu1 %v316_v3  ;;  %838 = vmatprep.subr.mxu0 %v299_v4  ;;  %v314_v11 = vld [vmem:[%s1338_s19 + $0x168] sm:$0xff]  ;;  %v297_v12 = vld [vmem:[%s1338_s19 + $0xe0] sm:$0xff]  ;;  %v296_v16 = vld [vmem:[%s1338_s19 + $0xd8] sm:$0xff]  ;;  %s254_s22 = scalar_lea.vmem %s1520_s2, %s253_s21  ;;  %s694_s9 = scalar_lea.sflag [#allocation4], %s1334_s0 }
  0x46   : > { %873 = vmatprep.subr.mxu1 %v331_v5  ;;  %839 = vmatpush3.msra.mxu0 %v283_v6  ;;  %v329_v13 = vld [vmem:[%s1338_s19 + $0x1e0] sm:$0xff]  ;;  %v328_v17 = vld [vmem:[%s1338_s19 + $0x1d8] sm:$0xff]  ;;  %v295_v20 = vld [vmem:[%s1338_s19 + $0xd0] sm:$0xff]  ;;  %s1107_s20 = scalar_lea.vmem %s710_s7, 128  ;;  %p1535_p5 = scmp.ne.s32.totalorder %s1528_s24, 0 }
  0x47   : > { %874 = vmatpush3.msra.mxu1 %v315_v7  ;;  %840 = vmatprep.subr.mxu0 %v298_v8  ;;  %v281_v14 = vld [vmem:[%s1338_s19 + $0x60] sm:$0xff]  ;;  %v280_v18 = vld [vmem:[%s1338_s19 + $0x58] sm:$0xff]  ;;  %v327_v21 = vld [vmem:[%s1338_s19 + $0x1d0] sm:$0xff]  ;;  %p1108_p13 = scmp.ne.s32.totalorder %s710_s7, %s1107_s20  ;;  %s1198_s11 = smov [#allocation7]  }
  0x48   : > { %875 = vmatprep.subr.mxu1 %v330_v9  ;;  %v313_v15 = vld [vmem:[%s1338_s19 + $0x160] sm:$0xff]  ;;  %841 = vmatpush3.msra.mxu0 %v282_v10  ;;  %v312_v19 = vld [vmem:[%s1338_s19 + $0x158] sm:$0xff]  ;;  %v279_v22 = vld [vmem:[%s1338_s19 + $0x50] sm:$0xff]  ;;  %s1111_s5 = sshll.u32 %s1198_s11, 4  ;;  %s1112_s5 = int_to_ptr.vmem [resolvable:$false] %s1111_s5 }
  0x49   : > { %876 = vmatpush3.msra.mxu1 %v314_v11  ;;  %842 = vmatprep.subr.mxu0 %v297_v12  ;;  %v311_v23 = vld [vmem:[%s1338_s19 + $0x150] sm:$0xff]  ;;  %v294_v24 = vld [vmem:[%s1338_s19 + $0xc8] sm:$0xff]  ;;  %v293_v28 = vld [vmem:[%s1338_s19 + $0xc0] sm:$0xff]  ;;  %p1109_p1 = pnand %p1108_p13, %p1535_p5  ;;  %s1113_s15 = scalar_lea.vmem %s1112_s5, 256 }
  0x4a   : > { %877 = vmatprep.subr.mxu1 %v329_v13  ;;  %843 = vmatpush3.msra.mxu0 %v281_v14  ;;  %v326_v25 = vld [vmem:[%s1338_s19 + $0x1c8] sm:$0xff]  ;;  %v325_v29 = vld [vmem:[%s1338_s19 + $0x1c0] sm:$0xff]  ;;  %v292_v32 = vld [vmem:[%s1338_s19 + $0xb8] sm:$0xff]  ;;  %p1114_p7 = scmp.lt.s32.totalorder %s710_s7, %s1112_s5  ;;  %p1115_p8 = scmp.lt.s32.totalorder %s1113_s15, %s1107_s20 }
  0x4b   : > { %878 = vmatpush3.msra.mxu1 %v313_v15  ;;  %844 = vmatprep.subr.mxu0 %v296_v16  ;;  %v278_v26 = vld [vmem:[%s1338_s19 + $0x48] sm:$0xff]  ;;  %v277_v30 = vld [vmem:[%s1338_s19 + $0x40] sm:$0xff]  ;;  %v324_v33 = vld [vmem:[%s1338_s19 + $0x1b8] sm:$0xff]  ;;  %p1110_p12 = pneg %p1109_p1 }
  0x4c   : > { %879 = vmatprep.subr.mxu1 %v328_v17  ;;  %845 = vmatpush3.msra.mxu0 %v280_v18  ;;  %v310_v27 = vld [vmem:[%s1338_s19 + $0x148] sm:$0xff]  ;;  %v309_v31 = vld [vmem:[%s1338_s19 + $0x140] sm:$0xff]  ;;  %v276_v34 = vld [vmem:[%s1338_s19 + $0x38] sm:$0xff]  ;;  %p1116_p9 = por %p1115_p8, %p1114_p7 }
  0x4d   : > { %880 = vmatpush3.msra.mxu1 %v312_v19  ;;  %846 = vmatprep.subr.mxu0 %v295_v20  ;;  %v308_v35 = vld [vmem:[%s1338_s19 + $0x138] sm:$0xff]  ;;  %v291_v36 = vld [vmem:[%s1338_s19 + $0xb0] sm:$0xff]  ;;  %v290_v40 = vld [vmem:[%s1338_s19 + $0xa8] sm:$0xff] }
  0x4e   : > { %881 = vmatprep.subr.mxu1 %v327_v21  ;;  %847 = vmatpush3.msra.mxu0 %v279_v22  ;;  %v323_v37 = vld [vmem:[%s1338_s19 + $0x1b0] sm:$0xff]  ;;  %v322_v41 = vld [vmem:[%s1338_s19 + $0x1a8] sm:$0xff]  ;;  %v289_v44 = vld [vmem:[%s1338_s19 + $0xa0] sm:$0xff]  ;;  %p1117_p0 = pnand %p1116_p9, %p1110_p12 }
  0x4f   : > { %882 = vmatpush3.msra.mxu1 %v311_v23  ;;  %848 = vmatprep.subr.mxu0 %v294_v24  ;;  %v275_v38 = vld [vmem:[%s1338_s19 + $0x30] sm:$0xff]  ;;  %v274_v42 = vld [vmem:[%s1338_s19 + $0x28] sm:$0xff]  ;;  %v321_v45 = vld [vmem:[%s1338_s19 + $0x1a0] sm:$0xff] }
  0x50   : > { %883 = vmatprep.subr.mxu1 %v326_v25  ;;  %849 = vmatpush3.msra.mxu0 %v278_v26  ;;  %v307_v39 = vld [vmem:[%s1338_s19 + $0x130] sm:$0xff]  ;;  %v306_v43 = vld [vmem:[%s1338_s19 + $0x128] sm:$0xff]  ;;  %v273_v46 = vld [vmem:[%s1338_s19 + $0x20] sm:$0xff] }
  0x51   : > { %884 = vmatpush3.msra.mxu1 %v310_v27  ;;  %850 = vmatprep.subr.mxu0 %v293_v28  ;;  %v305_v47 = vld [vmem:[%s1338_s19 + $0x120] sm:$0xff]  ;;  %v288_v48 = vld [vmem:[%s1338_s19 + $0x98] sm:$0xff]  ;;  %v287_v52 = vld [vmem:[%s1338_s19 + $0x90] sm:$0xff] }
  0x52   : > { %885 = vmatprep.subr.mxu1 %v325_v29  ;;  %851 = vmatpush3.msra.mxu0 %v277_v30  ;;  %v320_v49 = vld [vmem:[%s1338_s19 + $0x198] sm:$0xff]  ;;  %v319_v53 = vld [vmem:[%s1338_s19 + $0x190] sm:$0xff]  ;;  %v286_v56 = vld [vmem:[%s1338_s19 + $0x88] sm:$0xff] }
  0x53   : > { %886 = vmatpush3.msra.mxu1 %v309_v31  ;;  %852 = vmatprep.subr.mxu0 %v292_v32  ;;  %v272_v50 = vld [vmem:[%s1338_s19 + $0x18] sm:$0xff]  ;;  %v271_v54 = vld [vmem:[%s1338_s19 + $0x10] sm:$0xff]  ;;  %v318_v57 = vld [vmem:[%s1338_s19 + $0x188] sm:$0xff] }
  0x54   : > { %887 = vmatprep.subr.mxu1 %v324_v33  ;;  %853 = vmatpush3.msra.mxu0 %v276_v34  ;;  %v304_v51 = vld [vmem:[%s1338_s19 + $0x118] sm:$0xff]  ;;  %v303_v55 = vld [vmem:[%s1338_s19 + $0x110] sm:$0xff]  ;;  %v270_v58 = vld [vmem:[%s1338_s19 + $0x8] sm:$0xff] }
  0x55   : > { %888 = vmatpush3.msra.mxu1 %v308_v35  ;;  %854 = vmatprep.subr.mxu0 %v291_v36  ;;  %v302_v59 = vld [vmem:[%s1338_s19 + $0x108] sm:$0xff]  ;;  %v285_v60 = vld [vmem:[%s1338_s19 + $0x80] sm:$0xff]  ;;  %v264_v1 = vld [vmem:[#allocation2 + $0x18] sm:$0xff] }
  0x56   : > { %889 = vmatprep.subr.mxu1 %v323_v37  ;;  %855 = vmatpush3.msra.mxu0 %v275_v38  ;;  %v317_v61 = vld [vmem:[%s1338_s19 + $0x180] sm:$0xff]  ;;  %v262_v63 = vld [vmem:[#allocation2 + $0x8] sm:$0xff]  ;;  %v263_v3 = vld [vmem:[#allocation2 + $0x10] sm:$0xff] }
  0x57   : > { %890 = vmatpush3.msra.mxu1 %v307_v39  ;;  %856 = vmatprep.subr.mxu0 %v290_v40  ;;  %v269_v62 = vld [vmem:[%s1338_s19] sm:$0xff]  ;;  %v364_v4 = vld [vmem:[%s1338_s19 + $0x2f8] sm:$0xff]  ;;  %v363_v8 = vld [vmem:[%s1338_s19 + $0x2f0] sm:$0xff] }
  0x58   : > { %891 = vmatprep.subr.mxu1 %v322_v41  ;;  %857 = vmatpush3.msra.mxu0 %v274_v42  ;;  %v301_v0 = vld [vmem:[%s1338_s19 + $0x100] sm:$0xff]  ;;  %v396_v5 = vld [vmem:[%s1338_s19 + $0x3f8] sm:$0xff]  ;;  %v395_v9 = vld [vmem:[%s1338_s19 + $0x3f0] sm:$0xff] }
  0x59   : > { %892 = vmatpush3.msra.mxu1 %v306_v43  ;;  %858 = vmatprep.subr.mxu0 %v289_v44  ;;  %v261_v2 = vld [vmem:[#allocation2] sm:$0xff]  ;;  %v348_v6 = vld [vmem:[%s1338_s19 + $0x278] sm:$0xff]  ;;  %v347_v10 = vld [vmem:[%s1338_s19 + $0x270] sm:$0xff] }
  0x5a   : > { %893 = vmatprep.subr.mxu1 %v321_v45  ;;  %859 = vmatpush3.msra.mxu0 %v273_v46  ;;  %v380_v7 = vld [vmem:[%s1338_s19 + $0x378] sm:$0xff]  ;;  %v379_v11 = vld [vmem:[%s1338_s19 + $0x370] sm:$0xff]  ;;  %v362_v12 = vld [vmem:[%s1338_s19 + $0x2e8] sm:$0xff] }
  0x5b   : > { %894 = vmatpush3.msra.mxu1 %v305_v47  ;;  %860 = vmatprep.subr.mxu0 %v288_v48  ;;  %v394_v13 = vld [vmem:[%s1338_s19 + $0x3e8] sm:$0xff]  ;;  %v361_v16 = vld [vmem:[%s1338_s19 + $0x2e0] sm:$0xff]  ;;  %v360_v20 = vld [vmem:[%s1338_s19 + $0x2d8] sm:$0xff] }
  0x5c   : > { %895 = vmatprep.subr.mxu1 %v320_v49  ;;  %861 = vmatpush3.msra.mxu0 %v272_v50  ;;  %v346_v14 = vld [vmem:[%s1338_s19 + $0x268] sm:$0xff]  ;;  %v393_v17 = vld [vmem:[%s1338_s19 + $0x3e0] sm:$0xff]  ;;  %v392_v21 = vld [vmem:[%s1338_s19 + $0x3d8] sm:$0xff] }
  0x5d   : > { %896 = vmatpush3.msra.mxu1 %v304_v51  ;;  %862 = vmatprep.subr.mxu0 %v287_v52  ;;  %v378_v15 = vld [vmem:[%s1338_s19 + $0x368] sm:$0xff]  ;;  %v345_v18 = vld [vmem:[%s1338_s19 + $0x260] sm:$0xff]  ;;  %v344_v22 = vld [vmem:[%s1338_s19 + $0x258] sm:$0xff] }
  0x5e   : > { %897 = vmatprep.subr.mxu1 %v319_v53  ;;  %863 = vmatpush3.msra.mxu0 %v271_v54  ;;  %v377_v19 = vld [vmem:[%s1338_s19 + $0x360] sm:$0xff]  ;;  %v376_v23 = vld [vmem:[%s1338_s19 + $0x358] sm:$0xff]  ;;  %v359_v24 = vld [vmem:[%s1338_s19 + $0x2d0] sm:$0xff] }
  0x5f   : > { %898 = vmatpush3.msra.mxu1 %v303_v55  ;;  %864 = vmatprep.subr.mxu0 %v286_v56  ;;  %v391_v25 = vld [vmem:[%s1338_s19 + $0x3d0] sm:$0xff]  ;;  %v358_v28 = vld [vmem:[%s1338_s19 + $0x2c8] sm:$0xff]  ;;  %v357_v32 = vld [vmem:[%s1338_s19 + $0x2c0] sm:$0xff] }
  0x60   : > { %899 = vmatprep.subr.mxu1 %v318_v57  ;;  %865 = vmatpush3.msra.mxu0 %v270_v58  ;;  %v343_v26 = vld [vmem:[%s1338_s19 + $0x250] sm:$0xff]  ;;  %v390_v29 = vld [vmem:[%s1338_s19 + $0x3c8] sm:$0xff]  ;;  %v389_v33 = vld [vmem:[%s1338_s19 + $0x3c0] sm:$0xff] }
  0x61   : > { %900 = vmatpush3.msra.mxu1 %v302_v59  ;;  %866 = vmatprep.subr.mxu0 %v285_v60  ;;  %v375_v27 = vld [vmem:[%s1338_s19 + $0x350] sm:$0xff]  ;;  %v342_v30 = vld [vmem:[%s1338_s19 + $0x248] sm:$0xff]  ;;  %v341_v34 = vld [vmem:[%s1338_s19 + $0x240] sm:$0xff] }
  0x62   : > { %901 = vmatprep.subr.mxu1 %v317_v61  ;;  %867 = vmatpush3.msra.mxu0 %v269_v62  ;;  %v374_v31 = vld [vmem:[%s1338_s19 + $0x348] sm:$0xff]  ;;  %v373_v35 = vld [vmem:[%s1338_s19 + $0x340] sm:$0xff]  ;;  %v356_v36 = vld [vmem:[%s1338_s19 + $0x2b8] sm:$0xff] }
  0x63   : > { %461 = vmatprep.mubr.f32.mxu0 %v262_v63  ;;  %902 = vmatpush3.msra.mxu1 %v301_v0  ;;  %v388_v37 = vld [vmem:[%s1338_s19 + $0x3b8] sm:$0xff]  ;;  %v355_v40 = vld [vmem:[%s1338_s19 + $0x2b0] sm:$0xff]  ;;  %v354_v44 = vld [vmem:[%s1338_s19 + $0x2a8] sm:$0xff] }
  0x64   : > { %531 = vmatprep.mubr.f32.mxu1 %v264_v1  ;;  %462 = vmatmul.mubr.f32.vlgmr.msra.gmra.mxu0 %v261_v2  ;;  %v340_v38 = vld [vmem:[%s1338_s19 + $0x238] sm:$0xff]  ;;  %v387_v41 = vld [vmem:[%s1338_s19 + $0x3b0] sm:$0xff]  ;;  %v386_v45 = vld [vmem:[%s1338_s19 + $0x3a8] sm:$0xff] }
  0x65   : > { %532 = vmatmul.mubr.f32.vlgmr.msra.gmra.mxu1 %v263_v3  ;;  %906 = vmatprep.subr.mxu0 %v364_v4  ;;  %v372_v39 = vld [vmem:[%s1338_s19 + $0x338] sm:$0xff]  ;;  %v339_v42 = vld [vmem:[%s1338_s19 + $0x230] sm:$0xff]  ;;  %v338_v46 = vld [vmem:[%s1338_s19 + $0x228] sm:$0xff] }
  0x66   : > { %941 = vmatprep.subr.mxu1 %v396_v5  ;;  %907 = vmatpush3.msra.mxu0 %v348_v6  ;;  %v371_v43 = vld [vmem:[%s1338_s19 + $0x330] sm:$0xff]  ;;  %v370_v47 = vld [vmem:[%s1338_s19 + $0x328] sm:$0xff]  ;;  %v353_v48 = vld [vmem:[%s1338_s19 + $0x2a0] sm:$0xff] }
  0x67   : > { %942 = vmatpush3.msra.mxu1 %v380_v7  ;;  %908 = vmatprep.subr.mxu0 %v363_v8  ;;  %v385_v49 = vld [vmem:[%s1338_s19 + $0x3a0] sm:$0xff]  ;;  %v352_v52 = vld [vmem:[%s1338_s19 + $0x298] sm:$0xff]  ;;  %v351_v56 = vld [vmem:[%s1338_s19 + $0x290] sm:$0xff] }
  0x68   : > { %943 = vmatprep.subr.mxu1 %v395_v9  ;;  %909 = vmatpush3.msra.mxu0 %v347_v10  ;;  %v337_v50 = vld [vmem:[%s1338_s19 + $0x220] sm:$0xff]  ;;  %v384_v53 = vld [vmem:[%s1338_s19 + $0x398] sm:$0xff]  ;;  %v383_v57 = vld [vmem:[%s1338_s19 + $0x390] sm:$0xff] }
  0x69   : > { %944 = vmatpush3.msra.mxu1 %v379_v11  ;;  %910 = vmatprep.subr.mxu0 %v362_v12  ;;  %v369_v51 = vld [vmem:[%s1338_s19 + $0x320] sm:$0xff]  ;;  %v336_v54 = vld [vmem:[%s1338_s19 + $0x218] sm:$0xff]  ;;  %v335_v58 = vld [vmem:[%s1338_s19 + $0x210] sm:$0xff] }
  0x6a   : > { %945 = vmatprep.subr.mxu1 %v394_v13  ;;  %911 = vmatpush3.msra.mxu0 %v346_v14  ;;  %v368_v55 = vld [vmem:[%s1338_s19 + $0x318] sm:$0xff]  ;;  %v367_v59 = vld [vmem:[%s1338_s19 + $0x310] sm:$0xff]  ;;  %v350_v60 = vld [vmem:[%s1338_s19 + $0x288] sm:$0xff] }
  0x6b   : > { %946 = vmatpush3.msra.mxu1 %v378_v15  ;;  %912 = vmatprep.subr.mxu0 %v361_v16  ;;  %v382_v61 = vld [vmem:[%s1338_s19 + $0x388] sm:$0xff]  ;;  %v349_v0 = vld [vmem:[%s1338_s19 + $0x280] sm:$0xff]  ;;  %v268_v5 = vld [vmem:[#allocation2 + $0x38] sm:$0xff] }
  0x6c   : > { %947 = vmatprep.subr.mxu1 %v393_v17  ;;  %913 = vmatpush3.msra.mxu0 %v345_v18  ;;  %v334_v62 = vld [vmem:[%s1338_s19 + $0x208] sm:$0xff]  ;;  %v381_v1 = vld [vmem:[%s1338_s19 + $0x380] sm:$0xff]  ;;  %v267_v7 = vld [vmem:[#allocation2 + $0x30] sm:$0xff] }
  0x6d   : > { %948 = vmatpush3.msra.mxu1 %v377_v19  ;;  %914 = vmatprep.subr.mxu0 %v360_v20  ;;  %v366_v63 = vld [vmem:[%s1338_s19 + $0x308] sm:$0xff]  ;;  %v333_v2 = vld [vmem:[%s1338_s19 + $0x200] sm:$0xff] }
  0x6e   : > { %949 = vmatprep.subr.mxu1 %v392_v21  ;;  %915 = vmatpush3.msra.mxu0 %v344_v22  ;;  %v266_v3 = vld [vmem:[#allocation2 + $0x28] sm:$0xff]  ;;  %v365_v4 = vld [vmem:[%s1338_s19 + $0x300] sm:$0xff] }
  0x6f   : > { %950 = vmatpush3.msra.mxu1 %v376_v23  ;;  %916 = vmatprep.subr.mxu0 %v359_v24  ;;  %v265_v6 = vld [vmem:[#allocation2 + $0x20] sm:$0xff] }
  0x70   : > { %951 = vmatprep.subr.mxu1 %v391_v25  ;;  %917 = vmatpush3.msra.mxu0 %v343_v26  ;;  %v831_v23 = vld [vmem:[%s254_s22] ss:$0 sm:$0xff] }
  0x71   : > { %952 = vmatpush3.msra.mxu1 %v375_v27  ;;  %918 = vmatprep.subr.mxu0 %v358_v28 }
  0x72   : > { %953 = vmatprep.subr.mxu1 %v390_v29  ;;  %919 = vmatpush3.msra.mxu0 %v342_v30 }
  0x73   : > { %954 = vmatpush3.msra.mxu1 %v374_v31  ;;  %920 = vmatprep.subr.mxu0 %v357_v32 }
  0x74   : > { %955 = vmatprep.subr.mxu1 %v389_v33  ;;  %921 = vmatpush3.msra.mxu0 %v341_v34 }
  0x75   : > { %956 = vmatpush3.msra.mxu1 %v373_v35  ;;  %922 = vmatprep.subr.mxu0 %v356_v36 }
  0x76   : > { %957 = vmatprep.subr.mxu1 %v388_v37  ;;  %923 = vmatpush3.msra.mxu0 %v340_v38 }
  0x77   : > { %958 = vmatpush3.msra.mxu1 %v372_v39  ;;  %924 = vmatprep.subr.mxu0 %v355_v40 }
  0x78   : > { %959 = vmatprep.subr.mxu1 %v387_v41  ;;  %925 = vmatpush3.msra.mxu0 %v339_v42 }
  0x79   : > { %960 = vmatpush3.msra.mxu1 %v371_v43  ;;  %926 = vmatprep.subr.mxu0 %v354_v44 }
  0x7a   : > { %961 = vmatprep.subr.mxu1 %v386_v45  ;;  %927 = vmatpush3.msra.mxu0 %v338_v46 }
  0x7b   : > { %962 = vmatpush3.msra.mxu1 %v370_v47  ;;  %928 = vmatprep.subr.mxu0 %v353_v48 }
  0x7c   : > { %963 = vmatprep.subr.mxu1 %v385_v49  ;;  %929 = vmatpush3.msra.mxu0 %v337_v50 }
  0x7d   : > { %964 = vmatpush3.msra.mxu1 %v369_v51  ;;  %930 = vmatprep.subr.mxu0 %v352_v52 }
  0x7e   : > { %965 = vmatprep.subr.mxu1 %v384_v53  ;;  %931 = vmatpush3.msra.mxu0 %v336_v54 }
  0x7f   : > { %966 = vmatpush3.msra.mxu1 %v368_v55  ;;  %932 = vmatprep.subr.mxu0 %v351_v56 }
  0x80   : > { %967 = vmatprep.subr.mxu1 %v383_v57  ;;  %933 = vmatpush3.msra.mxu0 %v335_v58 }
  0x81   : > { %968 = vmatpush3.msra.mxu1 %v367_v59  ;;  %934 = vmatprep.subr.mxu0 %v350_v60 }
  0x82   : > { %969 = vmatprep.subr.mxu1 %v382_v61  ;;  %935 = vmatpush3.msra.mxu0 %v334_v62 }
  0x83   : > { %970 = vmatpush3.msra.mxu1 %v366_v63  ;;  %936 = vmatprep.subr.mxu0 %v349_v0 }
  0x84   : > { %971 = vmatprep.subr.mxu1 %v381_v1  ;;  %937 = vmatpush3.msra.mxu0 %v333_v2 }
  0x85   : > { %601 = vmatprep.mubr.f32.mxu0 %v266_v3  ;;  %972 = vmatpush3.msra.mxu1 %v365_v4 }
  0x86   : > { %671 = vmatprep.mubr.f32.mxu1 %v268_v5  ;;  %602 = vmatmul.mubr.f32.vlgmr.msra.gmra.mxu0 %v265_v6 }
  0x87   : > { %672 = vmatmul.mubr.f32.vlgmr.msra.gmra.mxu1 %v267_v7 }
 0x124   : > { %v868_v8 = vpop.f32.mrf.mxu0 }
 0x125   : > { %v903_v9 = vpop.f32.mrf.mxu1 }
 0x126   : > { %v869_v10 = vpop.f32.mrf.mxu0 }
 0x127   : > { %v904_v11 = vpop.f32.mrf.mxu1  ;;  %v870_v12 = vadd.f32 %v869_v10, %v868_v8 }
 0x128   : > { %v905_v13 = vadd.f32 %v904_v11, %v903_v9 }
 0x12a   : > { %v534_v18 = vadd.f32 %v905_v13, %v870_v12 }
 0x146   : > { %v938_v14 = vpop.f32.mrf.mxu0 }
 0x147   : > { %v973_v15 = vpop.f32.mrf.mxu1 }
 0x148   : > { %v939_v16 = vpop.f32.mrf.mxu0 }
 0x149   : > { %v974_v17 = vpop.f32.mrf.mxu1  ;;  %v940_v19 = vadd.f32 %v939_v16, %v938_v14 }
 0x14a   : > { %v975_v21 = vadd.f32 %v974_v17, %v973_v15 }
 0x14b   : > { %v604_v20 = vadd.f32 %v940_v19, %v534_v18 }
 0x14d   : > { %v674_v22 = vadd.f32 %v975_v21, %v604_v20 }
 0x14f   : > { %v690_v24 = vadd.f32 %v831_v23, %v674_v22 }
 0x151   : > { %v691_v25 = vmax.f32 %v690_v24, 0.0 }
 0x153   : > { %692 = vst [vmem:[%s249_s30] sm:$0xff] %v691_v25 }
 0x154   : > { %1120 = shalt.err (!%p1117_p0)
}
 0x155   : > { %s1121_s18 = scalar_lea.hbm %s707_s10, 128  ;;  %s1125_s21 = scalar_lea.hbm %s1521_s3, 256 }
 0x156   : > { %p1122_p2 = scmp.ne.s32.totalorder %s707_s10, %s1121_s18  ;;  %p1126_p11 = scmp.lt.s32.totalorder %s707_s10, %s1521_s3 }
 0x157   : > { %p1127_p4 = scmp.lt.s32.totalorder %s1125_s21, %s1121_s18 }
 0x158   : > { %p1123_p6 = pnand %p1122_p2, %p1535_p5 }
 0x159   : > { %p1128_p3 = por %p1127_p4, %p1126_p11 }
 0x15a   : > { %p1124_p10 = pneg %p1123_p6 }
 0x15c   : > { %p1129_p13 = pnand %p1128_p3, %p1124_p10 }
 0x15e   : > { %1132 = shalt.err (!%p1129_p13)
}
 0x15f   : > { %982 = dma.vmem_to_hbm [thread:$0]  (%p1535_p5), %s710_s7, 128, %s707_s10, %s694_s9  }
 0x160 PF: > { %s721_s29 = sand.u32 1, %s1171_s12   ;;  %p1536_p1 = scmp.ne.s32.totalorder %s1529_s25, 0 }
 0x161   : > { %p1537_p12 = scmp.ge.s32.totalorder %s1191_s17, 2  ;;  %s722_s22 = scalar_lea.sflag [#allocation4], %s721_s29 }
 0x163   : > { %p993_p7 = pnand %p1537_p12, %p1536_p1 }
 0x165   : > { %p994_p8 = pneg %p993_p7 }
 0x167   : > { %1166 = dma.done.wait (%p994_p8), %s722_s22, 128  }
 0x168   : > { %1168 = vsyncadd (%p994_p8), %s722_s22, 4294967168  ;;  %s20_s17 = sadd.s32 1, %s1191_s17   ;;  %s1538_s12 = smov %s1175_s13 }
 0x169   : > { %p17_p9 = scmp.ge.s32.totalorder %s20_s17, 4   ;;  %s1539_s13 = smov %s1179_s14 }
 0x16a   : > { %s1540_s14 = smov %s1321_s6  ;;  %s1541_s15 = smov %s1187_s16 }
 0x16b   : > { %s1542_s16 = smov %s1544_s4  ;;  %19 = sbr.rel (!%p17_p9) target bundleno = 9 (0x9), region = 94 }
 0x170   :  { %727 = vsyncpa [#allocation3], 1 }
 0x171   :  { %729 = vsyncpa [#allocation3 + $0x1], 1 }
 0x172   :  { %730 = vsyncpa [#allocation6], 1 }
 0x173   :  { %732 = vsyncpa [#allocation6 + $0x1], 1 }
 0x174   :  { %733 = vsyncpa [#allocation4], 1 }
 0x175   :  { %735 = vsyncpa [#allocation4 + $0x1], 1 }

</bundles_post_ra>
